<compile_context>
chip_gen: v7x
topology: tpu7x:2x2x1
jax: 0.10.0
libtpu: 0.0.40
codegen_flags: <defaults>
</compile_context>

<pallas_src>
import functools

import jax
import jax.numpy as jnp
from jax.experimental import pallas as pl
from jax.experimental.pallas import tpu as pltpu

_PAD_LOGIT = -1.0e4  # exp(-1e4) == 0 in f32 -> padded elements contribute exactly 0
_TILE_ROW_CAP = 2048  # 1 MiB per f32 input tile


def _min_sublane_rows(dtype):
    """Minimum second-to-last tile dim for a dtype ((8,128) f32, (16,128) bf16, (32,128) int8)."""
    itemsize = jnp.dtype(dtype).itemsize
    if itemsize >= 4:
        return 8
    if itemsize == 2:
        return 16
    return 32


def _focal_bce_kernel(x_ref, t_ref, out_ref, *,
                      alpha, gamma, bce_weight, focal_weight):
    i = pl.program_id(0)  # streaming reduction axis ("arbitrary")

    @pl.when(i == 0)
    def _():
        out_ref[...] = jnp.zeros_like(out_ref)

    x = x_ref[...].astype(jnp.float32)
    t = t_ref[...].astype(jnp.float32)

    # One shared exponential: e = exp(-|x|) feeds both the numerically stable
    # BCE-with-logits softplus and the sigmoid.
    e = jnp.exp(-jnp.abs(x))
    bce = jnp.maximum(x, 0.0) - x * t + jnp.log1p(e)

    inv_1pe = 1.0 / (1.0 + e)
    p = jnp.where(x >= 0.0, inv_1pe, e * inv_1pe)          # sigmoid(x)
    one_minus_pt = p + t - 2.0 * (p * t)                   # == 1 - p_t (folded)

    # Specialize the focal modulation on the static gamma (gamma=2 -> square,
    # small integer -> multiply chain, otherwise generic pow).
    g = float(gamma)
    if g == 2.0:
        focal_factor = one_minus_pt * one_minus_pt
    elif g == float(int(g)) and 0.0 <= g <= 8.0:
        focal_factor = jnp.ones_like(one_minus_pt)
        for _ in range(int(g)):
            focal_factor = focal_factor * one_minus_pt
    else:
        focal_factor = jnp.power(one_minus_pt, g)

    # focal_weight * alpha_t folded into trace-time constants:
    #   fw * (alpha*t + (1-alpha)*(1-t)) = c0 + c1*t
    c0 = float(focal_weight) * (1.0 - float(alpha))
    c1 = float(focal_weight) * (2.0 * float(alpha) - 1.0)

    contrib = bce * (float(bce_weight) + (c0 + c1 * t) * focal_factor)

    # Per-vreg tree-add into the resident (8,128) output block (pure VPU adds,
    # no cross-lane work); the final reduction happens once in the wrapper.
    out_ref[...] += jnp.sum(contrib.reshape(-1, 8, 128), axis=0)


def focal_loss_bce(logits, targets, *, alpha=0.25, gamma=2.0,
                   bce_weight=1.0, focal_weight=1.0):
    """'mean'-reduced bce_weight*BCEWithLogits + focal_weight*sigmoid_focal_loss."""
    n = int(logits.size)
    assert n == int(targets.size)

    min_rows = max(_min_sublane_rows(logits.dtype),
                   _min_sublane_rows(targets.dtype))

    rows = pl.cdiv(n, 128)
    if rows <= _TILE_ROW_CAP:
        # Single tile, rounded up only to the dtype-minimum sublane multiple.
        tile_rows = min_rows * pl.cdiv(rows, min_rows)
    else:
        tile_rows = _TILE_ROW_CAP  # multiple of 32 -> OK for any dtype
    num_tiles = pl.cdiv(rows, tile_rows)
    padded_rows = num_tiles * tile_rows
    padded_len = padded_rows * 128

    # Flatten + pad to a whole number of (tile_rows, 128) tiles.  Pad logits
    # with a large-negative value and targets with 0 so padded elements
    # contribute exactly zero (no in-kernel mask needed).  Inputs stay in
    # their native dtype (the kernel upcasts to f32 internally).
    flat_x = logits.reshape(-1)
    flat_t = targets.reshape(-1)
    pad = padded_len - n
    if pad:
        flat_x = jnp.pad(flat_x, (0, pad), constant_values=_PAD_LOGIT)
        flat_t = jnp.pad(flat_t, (0, pad))
    x2 = flat_x.reshape(padded_rows, 128)
    t2 = flat_t.reshape(padded_rows, 128)

    kernel = functools.partial(
        _focal_bce_kernel,
        alpha=float(alpha), gamma=float(gamma),
        bce_weight=float(bce_weight), focal_weight=float(focal_weight))

    partial_sums = pl.pallas_call(
        kernel,
        out_shape=jax.ShapeDtypeStruct((8, 128), jnp.float32),
        grid=(num_tiles,),
        in_specs=[
            pl.BlockSpec((tile_rows, 128), lambda i: (i, 0)),
            pl.BlockSpec((tile_rows, 128), lambda i: (i, 0)),
        ],
        out_specs=pl.BlockSpec((8, 128), lambda i: (0, 0)),
        compiler_params=pltpu.CompilerParams(
            dimension_semantics=("arbitrary",)),
    )(x2, t2)

    return jnp.sum(partial_sums) * jnp.float32(1.0 / n)


def _reference(logits, targets, *, alpha=0.25, gamma=2.0,
               bce_weight=1.0, focal_weight=1.0):
    x = logits.astype(jnp.float32)
    t = targets.astype(jnp.float32)
    bce = jnp.maximum(x, 0.0) - x * t + jnp.log1p(jnp.exp(-jnp.abs(x)))
    p = jax.nn.sigmoid(x)
    p_t = p * t + (1.0 - p) * (1.0 - t)
    focal = bce * (1.0 - p_t) ** gamma
    alpha_t = alpha * t + (1.0 - alpha) * (1.0 - t)
    focal = alpha_t * focal
    return bce_weight * jnp.mean(bce) + focal_weight * jnp.mean(focal)


if __name__ == "__main__":
    key = jax.random.PRNGKey(0)

    # Test 1: classifier-output-like NCHW shape (2, 4, 16, 16).
    k1, k2, k3, k4 = jax.random.split(key, 4)
    shape = (2, 4, 16, 16)
    logits = jax.random.normal(k1, shape, dtype=jnp.float32) * 2.0
    targets = jax.random.bernoulli(k2, p=0.3, shape=shape).astype(jnp.float32)

    loss = focal_loss_bce(logits, targets, alpha=0.25, gamma=2.0,
                          bce_weight=1.0, focal_weight=1.0)
    loss = jax.block_until_ready(loss)
    ref = _reference(logits, targets, alpha=0.25, gamma=2.0,
                     bce_weight=1.0, focal_weight=1.0)
    assert jnp.allclose(loss, ref, rtol=1e-5, atol=1e-6), (loss, ref)

    # Test 2: ragged element count (not a multiple of 128) exercises the
    # zero-contribution padding path.
    shape2 = (2, 3, 10, 7)
    logits2 = jax.random.normal(k3, shape2, dtype=jnp.float32) * 3.0
    targets2 = jax.random.bernoulli(k4, p=0.5, shape=shape2).astype(jnp.float32)

    loss2 = focal_loss_bce(logits2, targets2, alpha=0.25, gamma=2.0,
                           bce_weight=1.0, focal_weight=1.0)
    loss2 = jax.block_until_ready(loss2)
    ref2 = _reference(logits2, targets2, alpha=0.25, gamma=2.0,
                      bce_weight=1.0, focal_weight=1.0)
    assert jnp.allclose(loss2, ref2, rtol=1e-5, atol=1e-6), (loss2, ref2)

    print("KERNEL_OK")
</pallas_src>

<mosaic_0001>
module attributes {stable_mosaic.version = 11 : i64} {
  func.func @_focal_bce_kernel(%arg0: i32, %arg1: memref<16x128xf32, #tpu.memory_space<vmem>>, %arg2: memref<16x128xf32, #tpu.memory_space<vmem>>, %arg3: memref<8x128xf32, #tpu.memory_space<vmem>>) attributes {dimension_semantics = [#tpu.dimension_semantics<arbitrary>], iteration_bounds = array<i64: 1>, scalar_prefetch = 0 : i64, scratch_operands = 0 : i64, tpu.core_type = #tpu.core_type<tc>, window_params = [{transform_indices = @transform_0, window_bounds = array<i64: 16, 128>}, {transform_indices = @transform_1, window_bounds = array<i64: 16, 128>}, {pipeline_mode = #tpu.pipeline_mode<synchronous>, transform_indices = @transform_2, window_bounds = array<i64: 8, 128>}]} {
    %c0_i32 = arith.constant 0 : i32
    %0 = arith.cmpi eq, %arg0, %c0_i32 : i32
    %1 = arith.extui %0 : i1 to i32
    %c0_i32_0 = arith.constant 0 : i32
    %2 = arith.cmpi ne, %1, %c0_i32_0 : i32
    scf.if %2 {
      %cst_17 = arith.constant 0.000000e+00 : f32
      %42 = vector.broadcast %cst_17 : f32 to vector<8x128xf32>
      %c0_18 = arith.constant 0 : index
      %c0_19 = arith.constant 0 : index
      %43 = vector.load %arg3[%c0_18, %c0_19] : memref<8x128xf32, #tpu.memory_space<vmem>>, vector<8x128xf32>
      tpu.vector_store %arg3[%c0_18, %c0_19], %42 {strides = array<i32>} : memref<8x128xf32, #tpu.memory_space<vmem>>, vector<8x128xf32>,
    } else {
    }
    %c0 = arith.constant 0 : index
    %c0_1 = arith.constant 0 : index
    %3 = vector.load %arg1[%c0, %c0_1] : memref<16x128xf32, #tpu.memory_space<vmem>>, vector<16x128xf32>
    %c0_2 = arith.constant 0 : index
    %c0_3 = arith.constant 0 : index
    %4 = vector.load %arg2[%c0_2, %c0_3] : memref<16x128xf32, #tpu.memory_space<vmem>>, vector<16x128xf32>
    %5 = math.absf %3 : vector<16x128xf32>
    %cst = arith.constant 0.000000e+00 : f32
    %6 = vector.broadcast %cst : f32 to vector<16x128xf32>
    %7 = arith.subf %6, %5 : vector<16x128xf32>
    %8 = math.exp %7 : vector<16x128xf32>
    %cst_4 = arith.constant 0.000000e+00 : f32
    %9 = vector.broadcast %cst_4 : f32 to vector<16x128xf32>
    %10 = arith.maximumf %3, %9 : vector<16x128xf32>
    %11 = arith.mulf %3, %4 : vector<16x128xf32>
    %12 = arith.subf %10, %11 : vector<16x128xf32>
    %13 = math.log1p %8 : vector<16x128xf32>
    %14 = arith.addf %12, %13 : vector<16x128xf32>
    %cst_5 = arith.constant 1.000000e+00 : f32
    %15 = vector.broadcast %cst_5 : f32 to vector<16x128xf32>
    %16 = arith.addf %15, %8 : vector<16x128xf32>
    %cst_6 = arith.constant 1.000000e+00 : f32
    %17 = vector.broadcast %cst_6 : f32 to vector<16x128xf32>
    %18 = arith.divf %17, %16 : vector<16x128xf32>
    %cst_7 = arith.constant 0.000000e+00 : f32
    %19 = vector.broadcast %cst_7 : f32 to vector<16x128xf32>
    %20 = arith.cmpf oge, %3, %19 : vector<16x128xf32>
    %21 = arith.mulf %8, %18 : vector<16x128xf32>
    %22 = arith.select %20, %18, %21 : vector<16x128xi1>, vector<16x128xf32>
    %23 = arith.addf %22, %4 : vector<16x128xf32>
    %24 = arith.mulf %22, %4 : vector<16x128xf32>
    %cst_8 = arith.constant 2.000000e+00 : f32
    %25 = vector.broadcast %cst_8 : f32 to vector<16x128xf32>
    %26 = arith.mulf %25, %24 : vector<16x128xf32>
    %27 = arith.subf %23, %26 : vector<16x128xf32>
    %28 = arith.mulf %27, %27 : vector<16x128xf32>
    %cst_9 = arith.constant -5.000000e-01 : f32
    %29 = vector.broadcast %cst_9 : f32 to vector<16x128xf32>
    %30 = arith.mulf %29, %4 : vector<16x128xf32>
    %cst_10 = arith.constant 7.500000e-01 : f32
    %31 = vector.broadcast %cst_10 : f32 to vector<16x128xf32>
    %32 = arith.addf %31, %30 : vector<16x128xf32>
    %33 = arith.mulf %32, %28 : vector<16x128xf32>
    %cst_11 = arith.constant 1.000000e+00 : f32
    %34 = vector.broadcast %cst_11 : f32 to vector<16x128xf32>
    %35 = arith.addf %34, %33 : vector<16x128xf32>
    %36 = arith.mulf %14, %35 : vector<16x128xf32>
    %c0_12 = arith.constant 0 : index
    %c0_13 = arith.constant 0 : index
    %37 = vector.load %arg3[%c0_12, %c0_13] : memref<8x128xf32, #tpu.memory_space<vmem>>, vector<8x128xf32>
    %38 = vector.shape_cast %36 : vector<16x128xf32> to vector<2x8x128xf32>
    %cst_14 = arith.constant dense<0.000000e+00> : vector<8x128xf32>
    %39 = vector.multi_reduction <add>, %38, %cst_14 [0] : vector<2x8x128xf32> to vector<8x128xf32>
    %40 = arith.addf %37, %39 : vector<8x128xf32>
    %c0_15 = arith.constant 0 : index
    %c0_16 = arith.constant 0 : index
    %41 = vector.load %arg3[%c0_15, %c0_16] : memref<8x128xf32, #tpu.memory_space<vmem>>, vector<8x128xf32>
    tpu.vector_store %arg3[%c0_15, %c0_16], %40 {strides = array<i32>} : memref<8x128xf32, #tpu.memory_space<vmem>>, vector<8x128xf32>,
    return
  }
  func.func @transform_0(%arg0: i32) -> (i32, i32) {
    %c0_i32 = arith.constant 0 : i32
    %c0_i32_0 = arith.constant 0 : i32
    return %arg0, %c0_i32 : i32, i32
  }
  func.func @transform_1(%arg0: i32) -> (i32, i32) {
    %c0_i32 = arith.constant 0 : i32
    %c0_i32_0 = arith.constant 0 : i32
    return %arg0, %c0_i32 : i32, i32
  }
  func.func @transform_2(%arg0: i32) -> (i32, i32) {
    %c0_i32 = arith.constant 0 : i32
    %c0_i32_0 = arith.constant 0 : i32
    %c0_i32_1 = arith.constant 0 : i32
    return %c0_i32, %c0_i32_0 : i32, i32
  }
}

</mosaic_0001>

<bundles_post_ra>
// kernel: tpu_custom_call.1
= control target key start
LH: loop header
LB: loop body
LE: loop exit
PB: predicated region body
PF: predicated region fallthrough
CT: control target
= control target key end

     0   :  { %7 = vsyncpa [#allocation3], 0  ;;  %s287_s0 = inlined_call_operand.hbm [shape: f32[16,128], index: 0, kind: input, shape index: {}]   ;;  %s288_s1 = inlined_call_operand.hbm [shape: f32[16,128], index: 1, kind: input, shape index: {}]   ;;  %s289_s2 = inlined_call_operand.hbm [shape: f32[8,128], index: 2, kind: output, shape index: {}]  }
   0x1   :  { %8 = vsyncpa [#allocation6], 0 }
   0x2   :  { %9 = vsyncpa [#allocation4], 0  ;;  %s225_s9 = smov [#allocation2]   ;;  %s153_s13 = scalar_lea.hbm %s287_s0, 256 }
   0x3   :  { %s15_s10 = sshll.u32 %s225_s9, 4  ;;  %p154_p0 = scmp.ne.s32.totalorder %s287_s0, %s153_s13  ;;  %s16_s10 = int_to_ptr.vmem [resolvable:$true] %s15_s10 }
   0x4   :  { %p157_p1 = scmp.lt.u32.totalorder %s153_s13, %s287_s0 }
   0x6   :  { %p159_p2 = pnand %p157_p1, %p154_p0 }
   0x8   :  { %162 = shalt.err (!%p159_p2)
}
   0x9   :  { %s163_s18 = scalar_lea.vmem %s16_s10, 256  ;;  %p168_p4 = scmp.lt.s32.totalorder %s16_s10, %s16_s10 }
   0xa   :  { %p164_p3 = scmp.ne.s32.totalorder %s16_s10, %s163_s18  ;;  %p169_p5 = scmp.lt.s32.totalorder %s163_s18, %s163_s18 }
   0xc   :  { %p170_p6 = por %p169_p5, %p168_p4 }
   0xe   :  { %p171_p7 = pnand %p170_p6, %p164_p3 }
  0x10   :  { %174 = shalt.err (!%p171_p7)
}
  0x11   :  { %s226_s19 = smov 128   ;;  %s227_s20 = smov 8  }
  0x12   :  { %21 = dma.hbm_to_vmem [thread:$0]  %s287_s0, 256, %s16_s10, [#allocation3], %s226_s19, %s226_s19, %s227_s20  }
  0x13   :  { %s228_s23 = smov [#allocation5]   ;;  %s175_s27 = scalar_lea.hbm %s288_s1, 256 }
  0x14   :  { %s27_s24 = sshll.u32 %s228_s23, 4  ;;  %p176_p8 = scmp.ne.s32.totalorder %s288_s1, %s175_s27  ;;  %s28_s24 = int_to_ptr.vmem [resolvable:$true] %s27_s24 }
  0x15   :  { %p179_p9 = scmp.lt.u32.totalorder %s175_s27, %s288_s1 }
  0x17   :  { %p181_p10 = pnand %p179_p9, %p176_p8 }
  0x19   :  { %184 = shalt.err (!%p181_p10)
}
  0x1a   :  { %s185_s4 = scalar_lea.vmem %s28_s24, 256  ;;  %p190_p12 = scmp.lt.s32.totalorder %s28_s24, %s28_s24 }
  0x1b   :  { %p186_p11 = scmp.ne.s32.totalorder %s28_s24, %s185_s4  ;;  %p191_p13 = scmp.lt.s32.totalorder %s185_s4, %s185_s4 }
  0x1d   :  { %p192_p0 = por %p191_p13, %p190_p12 }
  0x1f   :  { %p193_p1 = pnand %p192_p0, %p186_p11 }
  0x21   :  { %196 = shalt.err (!%p193_p1)
}
  0x22   :  { %33 = dma.hbm_to_vmem [thread:$0]  %s288_s1, 256, %s28_s24, [#allocation6], %s226_s19, %s226_s19, %s227_s20  }
  0x23   :  { %219 = dma.done.wait [#allocation3], 256  }
  0x24   :  { %220 = vsyncadd [#allocation3], 4294967040 }
  0x25   :  { %221 = dma.done.wait [#allocation6], 256  }
  0x26   :  { %222 = vsyncadd [#allocation6], 4294967040  ;;  %v45_v0 = vld [vmem:[#allocation2] sm:$0xff]  ;;  %v46_v1 = vld [vmem:[#allocation2 + $0x8] sm:$0xff]  ;;  %s229_s1 = smov [#allocation7]  }
  0x27   :  { %v49_v2 = vand.u32 2147483647, %v45_v0  ;;  %v50_v3 = vand.u32 2147483647, %v46_v1  ;;  %v47_v15 = vld [vmem:[#allocation5] sm:$0xff]  ;;  %v57_v16 = vmax.f32 %v45_v0, 0.0 }
  0x28   :  { %vm89_vm0 = vcmp.ge.f32.partialorder %v45_v0, 0.0  ;;  %v59_v18 = vmul.f32 %v47_v15, %v45_v0  ;;  %vm90_vm1 = vcmp.ge.f32.partialorder %v46_v1, 0.0  ;;  %v48_v22 = vld [vmem:[#allocation5 + $0x8] sm:$0xff]  ;;  %v58_v23 = vmax.f32 %v46_v1, 0.0  ;;  %s125_s6 = sshll.u32 %s229_s1, 4  ;;  %s126_s6 = int_to_ptr.vmem [resolvable:$true] %s125_s6 }
  0x29   :  { %v51_v4 = vsub.f32 0.0, %v49_v2  ;;  %v52_v5 = vsub.f32 0.0, %v50_v3  ;;  %v60_v28 = vmul.f32 %v48_v22, %v46_v1  ;;  %v105_v31 = vmul.f32 -0.5, %v47_v15  ;;  %s197_s7 = scalar_lea.vmem %s126_s6, 128  ;;  %p202_p3 = scmp.lt.s32.totalorder %s126_s6, %s126_s6 }
  0x2a   :  { %v106_v35 = vmul.f32 -0.5, %v48_v22  ;;  %v61_v45 = vsub.f32 %v57_v16, %v59_v18  ;;  %p198_p2 = scmp.ne.s32.totalorder %s126_s6, %s197_s7  ;;  %p203_p4 = scmp.lt.s32.totalorder %s197_s7, %s197_s7 }
  0x2b   :  { %v53_v6 = vmul.f32 1.442695, %v51_v4  ;;  %v55_v7 = vmul.f32 1.442695, %v52_v5  ;;  %v107_v47 = vadd.f32 0.75, %v105_v31  ;;  %v62_v48 = vsub.f32 %v58_v23, %v60_v28 }
  0x2c   :  { %v108_v51 = vadd.f32 0.75, %v106_v35  ;;  %p204_p5 = por %p203_p4, %p202_p3 }
  0x2d   :  { %141 = vpow2.f32 %v53_v6 }
  0x2e   :  { %143 = vpow2.f32 %v55_v7  ;;  %p205_p6 = pnand %p204_p5, %p198_p2 }
  0x37   :  { %v142_v8 = vpop.eup %141 }
  0x38   :  { %v144_v9 = vpop.eup %143  ;;  %v63_v10 = vadd.f32 1.0, %v142_v8  ;;  %v66_v12 = vmul.f32 -0.5, %v142_v8  ;;  %v69_v24 = vand.u32 2147483647, %v142_v8 }
  0x39   :  { %v72_v11 = vadd.f32 1.0, %v144_v9  ;;  %v75_v13 = vmul.f32 -0.5, %v144_v9  ;;  %v78_v29 = vand.u32 2147483647, %v144_v9 }
  0x3a   :  { %145 = vrcp.f32 %v63_v10  ;;  %v67_v19 = vadd.f32 1.0, %v66_v12  ;;  %vm269_vm2 = vcmp.lt.f32.partialorder %v69_v24, 0.0004427343 }
  0x3b   :  { %147 = vrcp.f32 %v72_v11  ;;  %v76_v25 = vadd.f32 1.0, %v75_v13  ;;  %vm79_vm3 = vcmp.lt.f32.partialorder %v78_v29, 0.0004427343 }
  0x3c   :  { %149 = vlog2.f32 %v63_v10  ;;  %v68_v37 = vmul.f32 %v142_v8, %v67_v19 }
  0x3d   :  { %151 = vlog2.f32 %v72_v11  ;;  %v77_v42 = vmul.f32 %v144_v9, %v76_v25 }
  0x44   :  { %v146_v14 = vpop.eup %145 }
  0x45   :  { %v148_v17 = vpop.eup %147  ;;  %v91_v20 = vmul.f32 %v146_v14, %v142_v8 }
  0x46   :  { %v150_v21 = vpop.eup %149  ;;  %v92_v26 = vmul.f32 %v148_v17, %v144_v9 }
  0x47   :  { %v152_v27 = vpop.eup %151  ;;  %v93_v30 = vsel %vm89_vm0, %v146_v14, %v91_v20  ;;  %v65_v36 = vmul.f32 0.6931472, %v150_v21 }
  0x48   :  { %v94_v32 = vsel %vm90_vm1, %v148_v17, %v92_v26  ;;  %v95_v33 = vadd.f32 %v93_v30, %v47_v15  ;;  %v97_v34 = vmul.f32 %v93_v30, %v47_v15  ;;  %v74_v41 = vmul.f32 0.6931472, %v152_v27 }
  0x49   :  { %v96_v38 = vadd.f32 %v94_v32, %v48_v22  ;;  %v98_v39 = vmul.f32 %v94_v32, %v48_v22  ;;  %v71_v49 = vsel %vm269_vm2, %v68_v37, %v65_v36 }
  0x4a   :  { %v99_v43 = vmul.f32 2.0, %v97_v34  ;;  %v80_v52 = vsel %vm79_vm3, %v77_v42, %v74_v41  ;;  %v81_v55 = vadd.f32 %v71_v49, %v61_v45 }
  0x4b   :  { %v100_v44 = vmul.f32 2.0, %v98_v39  ;;  %v82_v57 = vadd.f32 %v80_v52, %v62_v48 }
  0x4c   :  { %v101_v46 = vsub.f32 %v95_v33, %v99_v43 }
  0x4d   :  { %v102_v50 = vsub.f32 %v96_v38, %v100_v44 }
  0x4e   :  { %v103_v53 = vmul.f32 %v101_v46, %v101_v46 }
  0x4f   :  { %v104_v54 = vmul.f32 %v102_v50, %v102_v50 }
  0x50   :  { %v109_v56 = vmul.f32 %v107_v47, %v103_v53 }
  0x51   :  { %v110_v58 = vmul.f32 %v108_v51, %v104_v54 }
  0x52   :  { %v111_v59 = vadd.f32 1.0, %v109_v56 }
  0x53   :  { %v112_v60 = vadd.f32 1.0, %v110_v58 }
  0x54   :  { %v113_v61 = vmul.f32 %v111_v59, %v81_v55 }
  0x55   :  { %v114_v62 = vmul.f32 %v112_v60, %v82_v57 }
  0x57   :  { %v116_v63 = vadd.f32 %v114_v62, %v113_v61 }
  0x59   :  { %118 = vst [vmem:[#allocation7] sm:$0xff] %v116_v63 }
  0x5a   :  { %208 = shalt.err (!%p205_p6)
}
  0x5b   :  { %s209_s10 = scalar_lea.hbm %s289_s2, 128 }
  0x5c   :  { %p210_p7 = scmp.ne.s32.totalorder %s289_s2, %s209_s10  ;;  %p213_p8 = scmp.lt.u32.totalorder %s209_s10, %s289_s2 }
  0x5e   :  { %p215_p9 = pnand %p213_p8, %p210_p7 }
  0x60   :  { %218 = shalt.err (!%p215_p9)
}
  0x61   :  { %128 = dma.vmem_to_hbm [thread:$0]  %s126_s6, 128, %s289_s2, [#allocation4]  }
  0x62   :  { %223 = dma.done.wait [#allocation4], 128  }
  0x63   :  { %224 = vsyncadd [#allocation4], 4294967168 }
  0x64   :  { %132 = vsyncpa [#allocation3], 1 }
  0x65   :  { %133 = vsyncpa [#allocation6], 1 }
  0x66   :  { %134 = vsyncpa [#allocation4], 1 }

</bundles_post_ra>
